<compile_context>
chip_gen: v7x
topology: tpu7x:2x2x1
jax: 0.10.0
libtpu: 0.0.40
codegen_flags: <defaults>
</compile_context>

<pallas_src>
import functools

import jax
import jax.numpy as jnp
import numpy as np
from jax.experimental import pallas as pl
from jax.experimental.pallas import tpu as pltpu

LANE = 128


def _round_up(n, m):
    return (n + m - 1) // m * m


# ----------------------------------------------------------------------------
# Fused Pallas kernel: encoder + processor + decoder + output, single step.
# ----------------------------------------------------------------------------
def _fused_encprocdec_kernel(
    xv_ref,       # (B, T, E*G, V)  raw variables, natural layout, f32
    ed_bias_ref,  # (G, NW)         per-node attr/bias contribution, f32
    dst_emb_ref,  # (H, CP)         precomputed encoder dst embedding, f32
    a_enc_ref,    # (H, G)  bf16    data   -> hidden adjacency
    a_hid_ref,    # (H, H)  bf16    hidden -> hidden adjacency
    a_dec_ref,    # (G, H)  bf16    hidden -> data adjacency
    w_ed_ref,     # (T, V, NW) bf16 enc_src | dec_dst | prognostic-skip
    w_p12_ref,    # (CP, 2CP) bf16  proc_1 | proc_2 fused
    b_p12_ref,    # (1, 2CP)  f32
    w_dsrc_ref,   # (CP, CP)  bf16  decoder src embed
    b_dsrc_ref,   # (1, CP)   f32
    w_out_ref,    # (CP, OP)  bf16  output projection
    b_out_ref,    # (1, OP)   f32
    o_ref,        # (BE*G, OP) f32
    *,
    be, n_data, n_hidden, cp, t_steps,
):
    f32, bf16 = jnp.float32, jnp.bfloat16
    G, H = n_data, n_hidden
    BG = be * G

    xv = xv_ref[...]                          # (B, T, E*G, V)
    w_ed = w_ed_ref[...]                      # (T, V, NW)
    V = xv.shape[-1]

    # --- fused enc-src / dec-dst embedding + prognostic-skip selection -------
    # Accumulate one small (BE*G, V) @ (V, NW) matmul per time step: this is
    # exactly x_data_latent @ [enc_src | dec_dst | skip_sel] without any
    # wrapper transpose; the attr_data / bias terms are in ed_bias.
    ed = jnp.concatenate([ed_bias_ref[...]] * be, axis=0)           # (BE*G, NW)
    for t in range(t_steps):
        xt = xv[:, t].reshape(BG, V).astype(bf16)
        ed = ed + jnp.dot(xt, w_ed[t], preferred_element_type=f32)
    src_emb = ed[:, :cp]             # (BE*G, CP)  encoder source embedding
    dec_dst = ed[:, cp:2 * cp]       # (BE*G, CP)  decoder destination embedding
    skip_add = ed[:, 2 * cp:]        # (BE*G, OP)  skip, already at output lanes

    # --- encoder (forward mapper): x_latent = gelu(A_enc @ src + dst_emb) ----
    a_enc = a_enc_ref[...]
    dst_emb = dst_emb_ref[...]
    x_latent = jnp.concatenate([
        jax.nn.gelu(
            jnp.dot(a_enc, src_emb[b * G:(b + 1) * G].astype(bf16),
                    preferred_element_type=f32) + dst_emb,
            approximate=True)
        for b in range(be)], axis=0)                                 # (BE*H, CP)

    # --- processor + residual (proc_1 | proc_2 fused) -------------------------
    h12 = (jnp.dot(x_latent.astype(bf16), w_p12_ref[...],
                   preferred_element_type=f32) + b_p12_ref[...])     # (BE*H, 2CP)
    a_hid = a_hid_ref[...]
    x_proc = jnp.concatenate([
        jax.nn.gelu(
            jnp.dot(a_hid, h12[b * H:(b + 1) * H, :cp].astype(bf16),
                    preferred_element_type=f32) + h12[b * H:(b + 1) * H, cp:],
            approximate=True)
        for b in range(be)], axis=0) + x_latent                      # (BE*H, CP)

    # --- decoder (backward mapper) --------------------------------------------
    src_d = (jnp.dot(x_proc.astype(bf16), w_dsrc_ref[...],
                     preferred_element_type=f32) + b_dsrc_ref[...])  # (BE*H, CP)
    a_dec = a_dec_ref[...]
    h_dec = jnp.concatenate([
        jax.nn.gelu(
            jnp.dot(a_dec, src_d[b * H:(b + 1) * H].astype(bf16),
                    preferred_element_type=f32) + dec_dst[b * G:(b + 1) * G],
            approximate=True)
        for b in range(be)], axis=0)                                 # (BE*G, CP)

    # --- output projection + prognostic skip (pure VPU add) -------------------
    x_out = (jnp.dot(h_dec.astype(bf16), w_out_ref[...],
                     preferred_element_type=f32) + b_out_ref[...]) + skip_add
    o_ref[...] = x_out.astype(o_ref.dtype)


# ----------------------------------------------------------------------------
# Model configuration (small synthetic shapes)
# ----------------------------------------------------------------------------
class Config:
    batch_size = 2
    ensemble = 1          # model-sharding asserts require ensemble==1 anyway
    multi_step = 2        # training.multistep_input
    num_vars = 4          # len(data_indices.model.input)
    num_out = 4           # len(data_indices.model.output)
    prognostic_in = (0, 1, 2)    # _internal_input_idx
    prognostic_out = (0, 1, 2)   # _internal_output_idx
    n_data = 16           # data grid nodes (multiple of 8)
    n_hidden = 8           # hidden grid nodes (multiple of 8)
    attr_data = 4          # node_attributes.attr_ndims[data]
    attr_hidden = 4        # node_attributes.attr_ndims[hidden]
    num_channels = 32      # model.num_channels

    @property
    def input_dim(self):
        return self.multi_step * self.num_vars + self.attr_data


# ----------------------------------------------------------------------------
# Deterministic parameter initialisation (synthetic, no checkpoint)
# ----------------------------------------------------------------------------
def init_params(key, cfg):
    def dense(k, fan_in, fan_out):
        kw, kb = jax.random.split(k)
        s = 1.0 / np.sqrt(fan_in)
        w = jax.random.uniform(kw, (fan_in, fan_out), jnp.float32, -s, s)
        b = jax.random.uniform(kb, (fan_out,), jnp.float32, -s, s)
        return w, b

    def adjacency(k, n_dst, n_src):
        a = jax.random.uniform(k, (n_dst, n_src), jnp.float32, 0.0, 1.0)
        return a / jnp.sum(a, axis=-1, keepdims=True)      # row-normalised

    keys = jax.random.split(key, 12)
    C = cfg.num_channels
    return {
        "attr_data": jax.random.uniform(keys[0], (cfg.n_data, cfg.attr_data),
                                        jnp.float32, -1.0, 1.0),
        "attr_hidden": jax.random.uniform(keys[1], (cfg.n_hidden, cfg.attr_hidden),
                                          jnp.float32, -1.0, 1.0),
        "A_enc": adjacency(keys[2], cfg.n_hidden, cfg.n_data),   # data  -> hidden
        "A_hid": adjacency(keys[3], cfg.n_hidden, cfg.n_hidden), # hidden-> hidden
        "A_dec": adjacency(keys[4], cfg.n_data, cfg.n_hidden),   # hidden-> data
        "enc_src": dense(keys[5], cfg.input_dim, C),
        "enc_dst": dense(keys[6], cfg.attr_hidden, C),
        "proc_1": dense(keys[7], C, C),
        "proc_2": dense(keys[8], C, C),
        "dec_src": dense(keys[9], C, C),
        "dec_dst": dense(keys[10], cfg.input_dim, C),
        "dec_out": dense(keys[11], C, cfg.num_out),
    }


# ----------------------------------------------------------------------------
# One-time packing: hoist batch-invariant work, fuse weights, cast to bf16.
# ----------------------------------------------------------------------------
def pack_params(params, cfg):
    C = cfg.num_channels
    T, V = cfg.multi_step, cfg.num_vars
    TV = T * V
    CP = _round_up(C, LANE)
    OP = _round_up(cfg.num_out, LANE)
    NW = 2 * CP + OP            # enc_src | dec_dst | prognostic-skip columns

    w_es, b_es = (np.asarray(a) for a in params["enc_src"])   # (TV+Ad, C), (C,)
    w_dd, b_dd = (np.asarray(a) for a in params["dec_dst"])
    w_eh, b_eh = (np.asarray(a) for a in params["enc_dst"])   # (Ah, C), (C,)
    w_p1, b_p1 = (np.asarray(a) for a in params["proc_1"])
    w_p2, b_p2 = (np.asarray(a) for a in params["proc_2"])
    w_ds, b_ds = (np.asarray(a) for a in params["dec_src"])
    w_o, b_o = (np.asarray(a) for a in params["dec_out"])     # (C, num_out)
    attr_d = np.asarray(params["attr_data"])                   # (G, Ad)
    attr_h = np.asarray(params["attr_hidden"])                 # (H, Ah)

    # Per-time-step fused weight (rows match x's natural layout -> no wrapper
    # transpose).  Last OP columns of the last time step hold the 0/1
    # prognostic-skip selection, so the skip rides along an existing matmul.
    w_ed = np.zeros((T, V, NW), np.float32)
    w_ed[:, :, :C] = w_es[:TV].reshape(T, V, C)
    w_ed[:, :, CP:CP + C] = w_dd[:TV].reshape(T, V, C)
    for i_in, i_out in zip(cfg.prognostic_in, cfg.prognostic_out):
        w_ed[T - 1, i_in, 2 * CP + i_out] = 1.0

    # Batch-invariant per-node contribution of attr_data + the linear biases.
    ed_bias = np.zeros((cfg.n_data, NW), np.float32)
    ed_bias[:, :C] = attr_d @ w_es[TV:] + b_es
    ed_bias[:, CP:CP + C] = attr_d @ w_dd[TV:] + b_dd

    # Batch-invariant encoder destination embedding (hidden node attrs).
    dst_emb = np.zeros((cfg.n_hidden, CP), np.float32)
    dst_emb[:, :C] = attr_h @ w_eh + b_eh

    # proc_1 | proc_2 fused (shared LHS = x_latent).
    w_p12 = np.zeros((CP, 2 * CP), np.float32)
    w_p12[:C, :C] = w_p1
    w_p12[:C, CP:CP + C] = w_p2
    b_p12 = np.zeros((1, 2 * CP), np.float32)
    b_p12[0, :C] = b_p1
    b_p12[0, CP:CP + C] = b_p2

    w_dsrc = np.zeros((CP, CP), np.float32)
    w_dsrc[:C, :C] = w_ds
    b_dsrc = np.zeros((1, CP), np.float32)
    b_dsrc[0, :C] = b_ds

    w_out = np.zeros((CP, OP), np.float32)
    w_out[:C, :cfg.num_out] = w_o
    b_out = np.zeros((1, OP), np.float32)
    b_out[0, :cfg.num_out] = b_o

    bf = jnp.bfloat16
    return {
        # bf16 MXU operands (f32 accumulation inside the kernel)
        "w_ed": jnp.asarray(w_ed, bf),                       # (T, V, NW)
        "A_enc": jnp.asarray(np.asarray(params["A_enc"]), bf),
        "A_hid": jnp.asarray(np.asarray(params["A_hid"]), bf),
        "A_dec": jnp.asarray(np.asarray(params["A_dec"]), bf),
        "w_p12": jnp.asarray(w_p12, bf),
        "w_dsrc": jnp.asarray(w_dsrc, bf),
        "w_out": jnp.asarray(w_out, bf),
        # f32 biases / precomputed embeddings
        "ed_bias": jnp.asarray(ed_bias),                     # (G, NW)
        "dst_emb": jnp.asarray(dst_emb),                     # (H, CP)
        "b_p12": jnp.asarray(b_p12),
        "b_dsrc": jnp.asarray(b_dsrc),
        "b_out": jnp.asarray(b_out),
    }


# ----------------------------------------------------------------------------
# Forward pass (mirrors AnemoiModelEncProcDec.forward)
# ----------------------------------------------------------------------------
def forward(packed, x, cfg):
    B, T, E, G, V = x.shape
    BE = B * E
    H = cfg.n_hidden
    CP = packed["dst_emb"].shape[-1]
    OP = packed["w_out"].shape[-1]
    NW = packed["w_ed"].shape[-1]

    # Natural layout input: only a free reshape of adjacent dims -- no
    # transpose, no attr concat, no 128-lane pad (those are folded into the
    # packed weights / biases).
    xv = x.reshape(B, T, E * G, V).astype(jnp.float32)

    kernel = functools.partial(
        _fused_encprocdec_kernel,
        be=BE, n_data=G, n_hidden=H, cp=CP, t_steps=T)

    out = pl.pallas_call(
        kernel,
        out_shape=jax.ShapeDtypeStruct((BE * G, OP), jnp.float32),
        grid=(1,),
        in_specs=[
            pl.BlockSpec((B, T, E * G, V), lambda i: (0, 0, 0, 0)),  # x vars
            pl.BlockSpec((G, NW), lambda i: (0, 0)),                 # ed_bias
            pl.BlockSpec((H, CP), lambda i: (0, 0)),                 # dst_emb
            pl.BlockSpec((H, G), lambda i: (0, 0)),                  # A_enc
            pl.BlockSpec((H, H), lambda i: (0, 0)),                  # A_hid
            pl.BlockSpec((G, H), lambda i: (0, 0)),                  # A_dec
            pl.BlockSpec((T, V, NW), lambda i: (0, 0, 0)),           # w_ed
            pl.BlockSpec((CP, 2 * CP), lambda i: (0, 0)),            # w_p12
            pl.BlockSpec((1, 2 * CP), lambda i: (0, 0)),             # b_p12
            pl.BlockSpec((CP, CP), lambda i: (0, 0)),                # w_dsrc
            pl.BlockSpec((1, CP), lambda i: (0, 0)),                 # b_dsrc
            pl.BlockSpec((CP, OP), lambda i: (0, 0)),                # w_out
            pl.BlockSpec((1, OP), lambda i: (0, 0)),                 # b_out
        ],
        out_specs=pl.BlockSpec((BE * G, OP), lambda i: (0, 0)),
        compiler_params=pltpu.CompilerParams(
            dimension_semantics=("arbitrary",)),
    )(
        xv, packed["ed_bias"], packed["dst_emb"],
        packed["A_enc"], packed["A_hid"], packed["A_dec"],
        packed["w_ed"], packed["w_p12"], packed["b_p12"],
        packed["w_dsrc"], packed["b_dsrc"],
        packed["w_out"], packed["b_out"],
    )

    # _assemble_output: the prognostic skip was already added in the kernel
    # (in f32; identical to the reference for f32 inputs).
    x_out = out[:, : cfg.num_out].reshape(B, E, G, cfg.num_out)
    # TODO(synk): model_config.model.bounding is empty -> no boundings applied.
    return x_out.astype(x.dtype)


# ----------------------------------------------------------------------------
# Pure-JAX reference (f32, HIGHEST precision) for a sanity check
# ----------------------------------------------------------------------------
def forward_reference(params, x, cfg):
    hp = jax.lax.Precision.HIGHEST

    def lin(z, w, b, act=None):
        y = jnp.dot(z, w, precision=hp) + b
        return jax.nn.gelu(y, approximate=True) if act == "gelu" else y

    def agg(adj, h, res):
        return jax.nn.gelu(
            jnp.einsum("mn,bnc->bmc", adj, h, precision=hp) + res,
            approximate=True)

    B, T, E, G, V = x.shape
    C, H, BE = cfg.num_channels, cfg.n_hidden, B * E
    x_skip = x[:, -1]
    node_attr_data = jnp.tile(params["attr_data"], (BE, 1))
    x_flat = jnp.transpose(x, (0, 2, 3, 1, 4)).reshape(BE * G, T * V)
    x_data_latent = jnp.concatenate([x_flat, node_attr_data], axis=-1)
    x_hidden_latent = jnp.tile(params["attr_hidden"], (BE, 1))

    src_emb = lin(x_data_latent, *params["enc_src"])
    dst_emb = lin(x_hidden_latent, *params["enc_dst"])
    x_latent = agg(params["A_enc"], src_emb.reshape(BE, G, C),
                   dst_emb.reshape(BE, H, C)).reshape(BE * H, C)

    h1 = lin(x_latent, *params["proc_1"])
    h2 = lin(x_latent, *params["proc_2"])
    x_latent_proc = agg(params["A_hid"], h1.reshape(BE, H, C),
                        h2.reshape(BE, H, C)).reshape(BE * H, C) + x_latent

    dst_emb_d = lin(x_data_latent, *params["dec_dst"])
    src_d = lin(x_latent_proc, *params["dec_src"])
    h_dec = agg(params["A_dec"], src_d.reshape(BE, H, C),
                dst_emb_d.reshape(BE, G, C)).reshape(BE * G, C)
    x_out = lin(h_dec, *params["dec_out"])

    x_out = x_out.reshape(B, E, G, cfg.num_out).astype(x.dtype)
    out_idx = jnp.array(cfg.prognostic_out)
    in_idx = jnp.array(cfg.prognostic_in)
    return x_out.at[..., out_idx].add(x_skip[..., in_idx])


# ----------------------------------------------------------------------------
if __name__ == "__main__":
    cfg = Config()
    key = jax.random.PRNGKey(0)
    k_params, k_x = jax.random.split(key)

    params = init_params(k_params, cfg)
    packed = pack_params(params, cfg)       # one-time hoist / fusion / bf16 cast

    # x: (batch, time, ensemble, grid, vars)
    x = jax.random.normal(
        k_x,
        (cfg.batch_size, cfg.multi_step, cfg.ensemble, cfg.n_data, cfg.num_vars),
        dtype=jnp.float32,
    )

    fwd = jax.jit(lambda p, xx: forward(p, xx, cfg))
    out = jax.block_until_ready(fwd(packed, x))

    ref = forward_reference(params, x, cfg)
    assert out.shape == (cfg.batch_size, cfg.ensemble, cfg.n_data, cfg.num_out)
    # bf16 weights / f32 accumulation vs f32 HIGHEST reference -> looser tol.
    np.testing.assert_allclose(np.asarray(out), np.asarray(ref),
                               atol=3e-2, rtol=3e-2)

    print("KERNEL_OK")
</pallas_src>

<mosaic_0001>
module attributes {stable_mosaic.version = 11 : i64} {
  func.func @_fused_encprocdec_kernel(%arg0: i32, %arg1: memref<2x2x16x4xf32, #tpu.memory_space<vmem>>, %arg2: memref<16x384xf32, #tpu.memory_space<vmem>>, %arg3: memref<8x128xf32, #tpu.memory_space<vmem>>, %arg4: memref<8x16xbf16, #tpu.memory_space<vmem>>, %arg5: memref<8x8xbf16, #tpu.memory_space<vmem>>, %arg6: memref<16x8xbf16, #tpu.memory_space<vmem>>, %arg7: memref<2x4x384xbf16, #tpu.memory_space<vmem>>, %arg8: memref<128x256xbf16, #tpu.memory_space<vmem>>, %arg9: memref<1x256xf32, #tpu.memory_space<vmem>>, %arg10: memref<128x128xbf16, #tpu.memory_space<vmem>>, %arg11: memref<1x128xf32, #tpu.memory_space<vmem>>, %arg12: memref<128x128xbf16, #tpu.memory_space<vmem>>, %arg13: memref<1x128xf32, #tpu.memory_space<vmem>>, %arg14: memref<32x128xf32, #tpu.memory_space<vmem>>) attributes {dimension_semantics = [#tpu.dimension_semantics<arbitrary>], iteration_bounds = array<i64: 1>, scalar_prefetch = 0 : i64, scratch_operands = 0 : i64, tpu.core_type = #tpu.core_type<tc>, window_params = [{pipeline_mode = #tpu.pipeline_mode<synchronous>, transform_indices = @transform_0, window_bounds = array<i64: 2, 2, 16, 4>}, {pipeline_mode = #tpu.pipeline_mode<synchronous>, transform_indices = @transform_1, window_bounds = array<i64: 16, 384>}, {pipeline_mode = #tpu.pipeline_mode<synchronous>, transform_indices = @transform_2, window_bounds = array<i64: 8, 128>}, {pipeline_mode = #tpu.pipeline_mode<synchronous>, transform_indices = @transform_3, window_bounds = array<i64: 8, 16>}, {pipeline_mode = #tpu.pipeline_mode<synchronous>, transform_indices = @transform_4, window_bounds = array<i64: 8, 8>}, {pipeline_mode = #tpu.pipeline_mode<synchronous>, transform_indices = @transform_5, window_bounds = array<i64: 16, 8>}, {pipeline_mode = #tpu.pipeline_mode<synchronous>, transform_indices = @transform_6, window_bounds = array<i64: 2, 4, 384>}, {pipeline_mode = #tpu.pipeline_mode<synchronous>, transform_indices = @transform_7, window_bounds = array<i64: 128, 256>}, {pipeline_mode = #tpu.pipeline_mode<synchronous>, transform_indices = @transform_8, window_bounds = array<i64: 1, 256>}, {pipeline_mode = #tpu.pipeline_mode<synchronous>, transform_indices = @transform_9, window_bounds = array<i64: 128, 128>}, {pipeline_mode = #tpu.pipeline_mode<synchronous>, transform_indices = @transform_10, window_bounds = array<i64: 1, 128>}, {pipeline_mode = #tpu.pipeline_mode<synchronous>, transform_indices = @transform_11, window_bounds = array<i64: 128, 128>}, {pipeline_mode = #tpu.pipeline_mode<synchronous>, transform_indices = @transform_12, window_bounds = array<i64: 1, 128>}, {pipeline_mode = #tpu.pipeline_mode<synchronous>, transform_indices = @transform_13, window_bounds = array<i64: 32, 128>}]} {
    %c0 = arith.constant 0 : index
    %c0_0 = arith.constant 0 : index
    %c0_1 = arith.constant 0 : index
    %c0_2 = arith.constant 0 : index
    %0 = vector.load %arg1[%c0, %c0_0, %c0_1, %c0_2] : memref<2x2x16x4xf32, #tpu.memory_space<vmem>>, vector<2x2x16x4xf32>
    %c0_3 = arith.constant 0 : index
    %c0_4 = arith.constant 0 : index
    %c0_5 = arith.constant 0 : index
    %1 = vector.load %arg7[%c0_3, %c0_4, %c0_5] : memref<2x4x384xbf16, #tpu.memory_space<vmem>>, vector<2x4x384xbf16>
    %c0_6 = arith.constant 0 : index
    %c0_7 = arith.constant 0 : index
    %2 = vector.load %arg2[%c0_6, %c0_7] : memref<16x384xf32, #tpu.memory_space<vmem>>, vector<16x384xf32>
    %3 = tpu.concatenate %2, %2 in 0 : vector<16x384xf32>, vector<16x384xf32> -> vector<32x384xf32>
    %4 = vector.extract_strided_slice %0 {offsets = [0, 0, 0, 0], sizes = [2, 1, 16, 4], strides = [1, 1, 1, 1]} : vector<2x2x16x4xf32> to vector<2x1x16x4xf32>
    %5 = vector.shape_cast %4 : vector<2x1x16x4xf32> to vector<2x16x4xf32>
    %6 = vector.shape_cast %5 : vector<2x16x4xf32> to vector<32x4xf32>
    %7 = arith.truncf %6 : vector<32x4xf32> to vector<32x4xbf16>
    %8 = vector.extract_strided_slice %1 {offsets = [0, 0, 0], sizes = [1, 4, 384], strides = [1, 1, 1]} : vector<2x4x384xbf16> to vector<1x4x384xbf16>
    %9 = vector.shape_cast %8 : vector<1x4x384xbf16> to vector<4x384xbf16>
    %cst = arith.constant dense<0.000000e+00> : vector<32x384xf32>
    %10 = tpu.matmul %7, %9, %cst {dimension_numbers = #tpu.dot_dimension_numbers<[1], [0], [0], [1], [0, 0, 1, 1], [], []>} : vector<32x4xbf16>, vector<4x384xbf16>, vector<32x384xf32> -> vector<32x384xf32>
    %11 = arith.addf %3, %10 : vector<32x384xf32>
    %12 = vector.extract_strided_slice %0 {offsets = [0, 1, 0, 0], sizes = [2, 1, 16, 4], strides = [1, 1, 1, 1]} : vector<2x2x16x4xf32> to vector<2x1x16x4xf32>
    %13 = vector.shape_cast %12 : vector<2x1x16x4xf32> to vector<2x16x4xf32>
    %14 = vector.shape_cast %13 : vector<2x16x4xf32> to vector<32x4xf32>
    %15 = arith.truncf %14 : vector<32x4xf32> to vector<32x4xbf16>
    %16 = vector.extract_strided_slice %1 {offsets = [1, 0, 0], sizes = [1, 4, 384], strides = [1, 1, 1]} : vector<2x4x384xbf16> to vector<1x4x384xbf16>
    %17 = vector.shape_cast %16 : vector<1x4x384xbf16> to vector<4x384xbf16>
    %cst_8 = arith.constant dense<0.000000e+00> : vector<32x384xf32>
    %18 = tpu.matmul %15, %17, %cst_8 {dimension_numbers = #tpu.dot_dimension_numbers<[1], [0], [0], [1], [0, 0, 1, 1], [], []>} : vector<32x4xbf16>, vector<4x384xbf16>, vector<32x384xf32> -> vector<32x384xf32>
    %19 = arith.addf %11, %18 : vector<32x384xf32>
    %20 = vector.extract_strided_slice %19 {offsets = [0, 0], sizes = [32, 128], strides = [1, 1]} : vector<32x384xf32> to vector<32x128xf32>
    %21 = vector.extract_strided_slice %19 {offsets = [0, 128], sizes = [32, 128], strides = [1, 1]} : vector<32x384xf32> to vector<32x128xf32>
    %22 = vector.extract_strided_slice %19 {offsets = [0, 256], sizes = [32, 128], strides = [1, 1]} : vector<32x384xf32> to vector<32x128xf32>
    %c0_9 = arith.constant 0 : index
    %c0_10 = arith.constant 0 : index
    %23 = vector.load %arg4[%c0_9, %c0_10] : memref<8x16xbf16, #tpu.memory_space<vmem>>, vector<8x16xbf16>
    %c0_11 = arith.constant 0 : index
    %c0_12 = arith.constant 0 : index
    %24 = vector.load %arg3[%c0_11, %c0_12] : memref<8x128xf32, #tpu.memory_space<vmem>>, vector<8x128xf32>
    %25 = vector.extract_strided_slice %20 {offsets = [0, 0], sizes = [16, 128], strides = [1, 1]} : vector<32x128xf32> to vector<16x128xf32>
    %26 = arith.truncf %25 : vector<16x128xf32> to vector<16x128xbf16>
    %cst_13 = arith.constant dense<0.000000e+00> : vector<8x128xf32>
    %27 = tpu.matmul %23, %26, %cst_13 {dimension_numbers = #tpu.dot_dimension_numbers<[1], [0], [0], [1], [0, 0, 1, 1], [], []>} : vector<8x16xbf16>, vector<16x128xbf16>, vector<8x128xf32> -> vector<8x128xf32>
    %28 = arith.addf %27, %24 : vector<8x128xf32>
    %29 = arith.mulf %28, %28 : vector<8x128xf32>
    %30 = arith.mulf %28, %29 : vector<8x128xf32>
    %cst_14 = arith.constant 4.471500e-02 : f32
    %31 = vector.broadcast %cst_14 : f32 to vector<8x128xf32>
    %32 = arith.mulf %31, %30 : vector<8x128xf32>
    %33 = arith.addf %28, %32 : vector<8x128xf32>
    %cst_15 = arith.constant 0.797884583 : f32
    %34 = vector.broadcast %cst_15 : f32 to vector<8x128xf32>
    %35 = arith.mulf %34, %33 : vector<8x128xf32>
    %36 = math.tanh %35 : vector<8x128xf32>
    %cst_16 = arith.constant 1.000000e+00 : f32
    %37 = vector.broadcast %cst_16 : f32 to vector<8x128xf32>
    %38 = arith.addf %37, %36 : vector<8x128xf32>
    %cst_17 = arith.constant 5.000000e-01 : f32
    %39 = vector.broadcast %cst_17 : f32 to vector<8x128xf32>
    %40 = arith.mulf %39, %38 : vector<8x128xf32>
    %41 = arith.mulf %28, %40 : vector<8x128xf32>
    %42 = vector.extract_strided_slice %20 {offsets = [16, 0], sizes = [16, 128], strides = [1, 1]} : vector<32x128xf32> to vector<16x128xf32>
    %43 = arith.truncf %42 : vector<16x128xf32> to vector<16x128xbf16>
    %cst_18 = arith.constant dense<0.000000e+00> : vector<8x128xf32>
    %44 = tpu.matmul %23, %43, %cst_18 {dimension_numbers = #tpu.dot_dimension_numbers<[1], [0], [0], [1], [0, 0, 1, 1], [], []>} : vector<8x16xbf16>, vector<16x128xbf16>, vector<8x128xf32> -> vector<8x128xf32>
    %45 = arith.addf %44, %24 : vector<8x128xf32>
    %46 = arith.mulf %45, %45 : vector<8x128xf32>
    %47 = arith.mulf %45, %46 : vector<8x128xf32>
    %cst_19 = arith.constant 4.471500e-02 : f32
    %48 = vector.broadcast %cst_19 : f32 to vector<8x128xf32>
    %49 = arith.mulf %48, %47 : vector<8x128xf32>
    %50 = arith.addf %45, %49 : vector<8x128xf32>
    %cst_20 = arith.constant 0.797884583 : f32
    %51 = vector.broadcast %cst_20 : f32 to vector<8x128xf32>
    %52 = arith.mulf %51, %50 : vector<8x128xf32>
    %53 = math.tanh %52 : vector<8x128xf32>
    %cst_21 = arith.constant 1.000000e+00 : f32
    %54 = vector.broadcast %cst_21 : f32 to vector<8x128xf32>
    %55 = arith.addf %54, %53 : vector<8x128xf32>
    %cst_22 = arith.constant 5.000000e-01 : f32
    %56 = vector.broadcast %cst_22 : f32 to vector<8x128xf32>
    %57 = arith.mulf %56, %55 : vector<8x128xf32>
    %58 = arith.mulf %45, %57 : vector<8x128xf32>
    %59 = tpu.concatenate %41, %58 in 0 : vector<8x128xf32>, vector<8x128xf32> -> vector<16x128xf32>
    %60 = arith.truncf %59 : vector<16x128xf32> to vector<16x128xbf16>
    %c0_23 = arith.constant 0 : index
    %c0_24 = arith.constant 0 : index
    %61 = vector.load %arg8[%c0_23, %c0_24] : memref<128x256xbf16, #tpu.memory_space<vmem>>, vector<128x256xbf16>
    %cst_25 = arith.constant dense<0.000000e+00> : vector<16x256xf32>
    %62 = tpu.matmul %60, %61, %cst_25 {dimension_numbers = #tpu.dot_dimension_numbers<[1], [0], [0], [1], [0, 0, 1, 1], [], []>} : vector<16x128xbf16>, vector<128x256xbf16>, vector<16x256xf32> -> vector<16x256xf32>
    %c0_26 = arith.constant 0 : index
    %c0_27 = arith.constant 0 : index
    %63 = vector.load %arg9[%c0_26, %c0_27] : memref<1x256xf32, #tpu.memory_space<vmem>>, vector<1x256xf32>
    %64 = vector.broadcast %63 : vector<1x256xf32> to vector<16x256xf32>
    %65 = arith.addf %62, %64 : vector<16x256xf32>
    %c0_28 = arith.constant 0 : index
    %c0_29 = arith.constant 0 : index
    %66 = vector.load %arg5[%c0_28, %c0_29] : memref<8x8xbf16, #tpu.memory_space<vmem>>, vector<8x8xbf16>
    %67 = vector.extract_strided_slice %65 {offsets = [0, 0], sizes = [8, 128], strides = [1, 1]} : vector<16x256xf32> to vector<8x128xf32>
    %68 = arith.truncf %67 : vector<8x128xf32> to vector<8x128xbf16>
    %cst_30 = arith.constant dense<0.000000e+00> : vector<8x128xf32>
    %69 = tpu.matmul %66, %68, %cst_30 {dimension_numbers = #tpu.dot_dimension_numbers<[1], [0], [0], [1], [0, 0, 1, 1], [], []>} : vector<8x8xbf16>, vector<8x128xbf16>, vector<8x128xf32> -> vector<8x128xf32>
    %70 = vector.extract_strided_slice %65 {offsets = [0, 128], sizes = [8, 128], strides = [1, 1]} : vector<16x256xf32> to vector<8x128xf32>
    %71 = arith.addf %69, %70 : vector<8x128xf32>
    %72 = arith.mulf %71, %71 : vector<8x128xf32>
    %73 = arith.mulf %71, %72 : vector<8x128xf32>
    %cst_31 = arith.constant 4.471500e-02 : f32
    %74 = vector.broadcast %cst_31 : f32 to vector<8x128xf32>
    %75 = arith.mulf %74, %73 : vector<8x128xf32>
    %76 = arith.addf %71, %75 : vector<8x128xf32>
    %cst_32 = arith.constant 0.797884583 : f32
    %77 = vector.broadcast %cst_32 : f32 to vector<8x128xf32>
    %78 = arith.mulf %77, %76 : vector<8x128xf32>
    %79 = math.tanh %78 : vector<8x128xf32>
    %cst_33 = arith.constant 1.000000e+00 : f32
    %80 = vector.broadcast %cst_33 : f32 to vector<8x128xf32>
    %81 = arith.addf %80, %79 : vector<8x128xf32>
    %cst_34 = arith.constant 5.000000e-01 : f32
    %82 = vector.broadcast %cst_34 : f32 to vector<8x128xf32>
    %83 = arith.mulf %82, %81 : vector<8x128xf32>
    %84 = arith.mulf %71, %83 : vector<8x128xf32>
    %85 = vector.extract_strided_slice %65 {offsets = [8, 0], sizes = [8, 128], strides = [1, 1]} : vector<16x256xf32> to vector<8x128xf32>
    %86 = arith.truncf %85 : vector<8x128xf32> to vector<8x128xbf16>
    %cst_35 = arith.constant dense<0.000000e+00> : vector<8x128xf32>
    %87 = tpu.matmul %66, %86, %cst_35 {dimension_numbers = #tpu.dot_dimension_numbers<[1], [0], [0], [1], [0, 0, 1, 1], [], []>} : vector<8x8xbf16>, vector<8x128xbf16>, vector<8x128xf32> -> vector<8x128xf32>
    %88 = vector.extract_strided_slice %65 {offsets = [8, 128], sizes = [8, 128], strides = [1, 1]} : vector<16x256xf32> to vector<8x128xf32>
    %89 = arith.addf %87, %88 : vector<8x128xf32>
    %90 = arith.mulf %89, %89 : vector<8x128xf32>
    %91 = arith.mulf %89, %90 : vector<8x128xf32>
    %cst_36 = arith.constant 4.471500e-02 : f32
    %92 = vector.broadcast %cst_36 : f32 to vector<8x128xf32>
    %93 = arith.mulf %92, %91 : vector<8x128xf32>
    %94 = arith.addf %89, %93 : vector<8x128xf32>
    %cst_37 = arith.constant 0.797884583 : f32
    %95 = vector.broadcast %cst_37 : f32 to vector<8x128xf32>
    %96 = arith.mulf %95, %94 : vector<8x128xf32>
    %97 = math.tanh %96 : vector<8x128xf32>
    %cst_38 = arith.constant 1.000000e+00 : f32
    %98 = vector.broadcast %cst_38 : f32 to vector<8x128xf32>
    %99 = arith.addf %98, %97 : vector<8x128xf32>
    %cst_39 = arith.constant 5.000000e-01 : f32
    %100 = vector.broadcast %cst_39 : f32 to vector<8x128xf32>
    %101 = arith.mulf %100, %99 : vector<8x128xf32>
    %102 = arith.mulf %89, %101 : vector<8x128xf32>
    %103 = tpu.concatenate %84, %102 in 0 : vector<8x128xf32>, vector<8x128xf32> -> vector<16x128xf32>
    %104 = arith.addf %103, %59 : vector<16x128xf32>
    %105 = arith.truncf %104 : vector<16x128xf32> to vector<16x128xbf16>
    %c0_40 = arith.constant 0 : index
    %c0_41 = arith.constant 0 : index
    %106 = vector.load %arg10[%c0_40, %c0_41] : memref<128x128xbf16, #tpu.memory_space<vmem>>, vector<128x128xbf16>
    %cst_42 = arith.constant dense<0.000000e+00> : vector<16x128xf32>
    %107 = tpu.matmul %105, %106, %cst_42 {dimension_numbers = #tpu.dot_dimension_numbers<[1], [0], [0], [1], [0, 0, 1, 1], [], []>} : vector<16x128xbf16>, vector<128x128xbf16>, vector<16x128xf32> -> vector<16x128xf32>
    %c0_43 = arith.constant 0 : index
    %c0_44 = arith.constant 0 : index
    %108 = vector.load %arg11[%c0_43, %c0_44] : memref<1x128xf32, #tpu.memory_space<vmem>>, vector<1x128xf32>
    %109 = vector.broadcast %108 : vector<1x128xf32> to vector<16x128xf32>
    %110 = arith.addf %107, %109 : vector<16x128xf32>
    %c0_45 = arith.constant 0 : index
    %c0_46 = arith.constant 0 : index
    %111 = vector.load %arg6[%c0_45, %c0_46] : memref<16x8xbf16, #tpu.memory_space<vmem>>, vector<16x8xbf16>
    %112 = vector.extract_strided_slice %110 {offsets = [0, 0], sizes = [8, 128], strides = [1, 1]} : vector<16x128xf32> to vector<8x128xf32>
    %113 = arith.truncf %112 : vector<8x128xf32> to vector<8x128xbf16>
    %cst_47 = arith.constant dense<0.000000e+00> : vector<16x128xf32>
    %114 = tpu.matmul %111, %113, %cst_47 {dimension_numbers = #tpu.dot_dimension_numbers<[1], [0], [0], [1], [0, 0, 1, 1], [], []>} : vector<16x8xbf16>, vector<8x128xbf16>, vector<16x128xf32> -> vector<16x128xf32>
    %115 = vector.extract_strided_slice %21 {offsets = [0, 0], sizes = [16, 128], strides = [1, 1]} : vector<32x128xf32> to vector<16x128xf32>
    %116 = arith.addf %114, %115 : vector<16x128xf32>
    %117 = arith.mulf %116, %116 : vector<16x128xf32>
    %118 = arith.mulf %116, %117 : vector<16x128xf32>
    %cst_48 = arith.constant 4.471500e-02 : f32
    %119 = vector.broadcast %cst_48 : f32 to vector<16x128xf32>
    %120 = arith.mulf %119, %118 : vector<16x128xf32>
    %121 = arith.addf %116, %120 : vector<16x128xf32>
    %cst_49 = arith.constant 0.797884583 : f32
    %122 = vector.broadcast %cst_49 : f32 to vector<16x128xf32>
    %123 = arith.mulf %122, %121 : vector<16x128xf32>
    %124 = math.tanh %123 : vector<16x128xf32>
    %cst_50 = arith.constant 1.000000e+00 : f32
    %125 = vector.broadcast %cst_50 : f32 to vector<16x128xf32>
    %126 = arith.addf %125, %124 : vector<16x128xf32>
    %cst_51 = arith.constant 5.000000e-01 : f32
    %127 = vector.broadcast %cst_51 : f32 to vector<16x128xf32>
    %128 = arith.mulf %127, %126 : vector<16x128xf32>
    %129 = arith.mulf %116, %128 : vector<16x128xf32>
    %130 = vector.extract_strided_slice %110 {offsets = [8, 0], sizes = [8, 128], strides = [1, 1]} : vector<16x128xf32> to vector<8x128xf32>
    %131 = arith.truncf %130 : vector<8x128xf32> to vector<8x128xbf16>
    %cst_52 = arith.constant dense<0.000000e+00> : vector<16x128xf32>
    %132 = tpu.matmul %111, %131, %cst_52 {dimension_numbers = #tpu.dot_dimension_numbers<[1], [0], [0], [1], [0, 0, 1, 1], [], []>} : vector<16x8xbf16>, vector<8x128xbf16>, vector<16x128xf32> -> vector<16x128xf32>
    %133 = vector.extract_strided_slice %21 {offsets = [16, 0], sizes = [16, 128], strides = [1, 1]} : vector<32x128xf32> to vector<16x128xf32>
    %134 = arith.addf %132, %133 : vector<16x128xf32>
    %135 = arith.mulf %134, %134 : vector<16x128xf32>
    %136 = arith.mulf %134, %135 : vector<16x128xf32>
    %cst_53 = arith.constant 4.471500e-02 : f32
    %137 = vector.broadcast %cst_53 : f32 to vector<16x128xf32>
    %138 = arith.mulf %137, %136 : vector<16x128xf32>
    %139 = arith.addf %134, %138 : vector<16x128xf32>
    %cst_54 = arith.constant 0.797884583 : f32
    %140 = vector.broadcast %cst_54 : f32 to vector<16x128xf32>
    %141 = arith.mulf %140, %139 : vector<16x128xf32>
    %142 = math.tanh %141 : vector<16x128xf32>
    %cst_55 = arith.constant 1.000000e+00 : f32
    %143 = vector.broadcast %cst_55 : f32 to vector<16x128xf32>
    %144 = arith.addf %143, %142 : vector<16x128xf32>
    %cst_56 = arith.constant 5.000000e-01 : f32
    %145 = vector.broadcast %cst_56 : f32 to vector<16x128xf32>
    %146 = arith.mulf %145, %144 : vector<16x128xf32>
    %147 = arith.mulf %134, %146 : vector<16x128xf32>
    %148 = tpu.concatenate %129, %147 in 0 : vector<16x128xf32>, vector<16x128xf32> -> vector<32x128xf32>
    %149 = arith.truncf %148 : vector<32x128xf32> to vector<32x128xbf16>
    %c0_57 = arith.constant 0 : index
    %c0_58 = arith.constant 0 : index
    %150 = vector.load %arg12[%c0_57, %c0_58] : memref<128x128xbf16, #tpu.memory_space<vmem>>, vector<128x128xbf16>
    %cst_59 = arith.constant dense<0.000000e+00> : vector<32x128xf32>
    %151 = tpu.matmul %149, %150, %cst_59 {dimension_numbers = #tpu.dot_dimension_numbers<[1], [0], [0], [1], [0, 0, 1, 1], [], []>} : vector<32x128xbf16>, vector<128x128xbf16>, vector<32x128xf32> -> vector<32x128xf32>
    %c0_60 = arith.constant 0 : index
    %c0_61 = arith.constant 0 : index
    %152 = vector.load %arg13[%c0_60, %c0_61] : memref<1x128xf32, #tpu.memory_space<vmem>>, vector<1x128xf32>
    %153 = vector.broadcast %152 : vector<1x128xf32> to vector<32x128xf32>
    %154 = arith.addf %151, %153 : vector<32x128xf32>
    %155 = arith.addf %154, %22 : vector<32x128xf32>
    %c0_62 = arith.constant 0 : index
    %c0_63 = arith.constant 0 : index
    %156 = vector.load %arg14[%c0_62, %c0_63] : memref<32x128xf32, #tpu.memory_space<vmem>>, vector<32x128xf32>
    tpu.vector_store %arg14[%c0_62, %c0_63], %155 {strides = array<i32>} : memref<32x128xf32, #tpu.memory_space<vmem>>, vector<32x128xf32>,
    return
  }
  func.func @transform_0(%arg0: i32) -> (i32, i32, i32, i32) {
    %c0_i32 = arith.constant 0 : i32
    %c0_i32_0 = arith.constant 0 : i32
    %c0_i32_1 = arith.constant 0 : i32
    %c0_i32_2 = arith.constant 0 : i32
    %c0_i32_3 = arith.constant 0 : i32
    return %c0_i32, %c0_i32_0, %c0_i32_1, %c0_i32_2 : i32, i32, i32, i32
  }
  func.func @transform_1(%arg0: i32) -> (i32, i32) {
    %c0_i32 = arith.constant 0 : i32
    %c0_i32_0 = arith.constant 0 : i32
    %c0_i32_1 = arith.constant 0 : i32
    return %c0_i32, %c0_i32_0 : i32, i32
  }
  func.func @transform_2(%arg0: i32) -> (i32, i32) {
    %c0_i32 = arith.constant 0 : i32
    %c0_i32_0 = arith.constant 0 : i32
    %c0_i32_1 = arith.constant 0 : i32
    return %c0_i32, %c0_i32_0 : i32, i32
  }
  func.func @transform_3(%arg0: i32) -> (i32, i32) {
    %c0_i32 = arith.constant 0 : i32
    %c0_i32_0 = arith.constant 0 : i32
    %c0_i32_1 = arith.constant 0 : i32
    return %c0_i32, %c0_i32_0 : i32, i32
  }
  func.func @transform_4(%arg0: i32) -> (i32, i32) {
    %c0_i32 = arith.constant 0 : i32
    %c0_i32_0 = arith.constant 0 : i32
    %c0_i32_1 = arith.constant 0 : i32
    return %c0_i32, %c0_i32_0 : i32, i32
  }
  func.func @transform_5(%arg0: i32) -> (i32, i32) {
    %c0_i32 = arith.constant 0 : i32
    %c0_i32_0 = arith.constant 0 : i32
    %c0_i32_1 = arith.constant 0 : i32
    return %c0_i32, %c0_i32_0 : i32, i32
  }
  func.func @transform_6(%arg0: i32) -> (i32, i32, i32) {
    %c0_i32 = arith.constant 0 : i32
    %c0_i32_0 = arith.constant 0 : i32
    %c0_i32_1 = arith.constant 0 : i32
    %c0_i32_2 = arith.constant 0 : i32
    return %c0_i32, %c0_i32_0, %c0_i32_1 : i32, i32, i32
  }
  func.func @transform_7(%arg0: i32) -> (i32, i32) {
    %c0_i32 = arith.constant 0 : i32
    %c0_i32_0 = arith.constant 0 : i32
    %c0_i32_1 = arith.constant 0 : i32
    return %c0_i32, %c0_i32_0 : i32, i32
  }
  func.func @transform_8(%arg0: i32) -> (i32, i32) {
    %c0_i32 = arith.constant 0 : i32
    %c0_i32_0 = arith.constant 0 : i32
    %c0_i32_1 = arith.constant 0 : i32
    return %c0_i32, %c0_i32_0 : i32, i32
  }
  func.func @transform_9(%arg0: i32) -> (i32, i32) {
    %c0_i32 = arith.constant 0 : i32
    %c0_i32_0 = arith.constant 0 : i32
    %c0_i32_1 = arith.constant 0 : i32
    return %c0_i32, %c0_i32_0 : i32, i32
  }
  func.func @transform_10(%arg0: i32) -> (i32, i32) {
    %c0_i32 = arith.constant 0 : i32
    %c0_i32_0 = arith.constant 0 : i32
    %c0_i32_1 = arith.constant 0 : i32
    return %c0_i32, %c0_i32_0 : i32, i32
  }
  func.func @transform_11(%arg0: i32) -> (i32, i32) {
    %c0_i32 = arith.constant 0 : i32
    %c0_i32_0 = arith.constant 0 : i32
    %c0_i32_1 = arith.constant 0 : i32
    return %c0_i32, %c0_i32_0 : i32, i32
  }
  func.func @transform_12(%arg0: i32) -> (i32, i32) {
    %c0_i32 = arith.constant 0 : i32
    %c0_i32_0 = arith.constant 0 : i32
    %c0_i32_1 = arith.constant 0 : i32
    return %c0_i32, %c0_i32_0 : i32, i32
  }
  func.func @transform_13(%arg0: i32) -> (i32, i32) {
    %c0_i32 = arith.constant 0 : i32
    %c0_i32_0 = arith.constant 0 : i32
    %c0_i32_1 = arith.constant 0 : i32
    return %c0_i32, %c0_i32_0 : i32, i32
  }
}

</mosaic_0001>

<bundles_post_ra>
// kernel: _lambda_.1
= control target key start
LH: loop header
LB: loop body
LE: loop exit
PB: predicated region body
PF: predicated region fallthrough
CT: control target
= control target key end

     0   :  { %18 = vsyncpa [#allocation3], 0  ;;  %s2074_s0 = inlined_call_operand.vmem [shape: f32[2,2,16,4], index: 0, kind: input, shape index: {}]   ;;  %s2075_s1 = inlined_call_operand.hbm [shape: f32[16,384], index: 1, kind: input, shape index: {}]   ;;  %s2076_s2 = inlined_call_operand.vmem [shape: f32[8,128], index: 2, kind: input, shape index: {}]   ;;  %s2077_s3 = inlined_call_operand.hbm [shape: bf16[8,16], index: 3, kind: input, shape index: {}]   ;;  %s2078_s4 = inlined_call_operand.hbm [shape: bf16[8,8], index: 4, kind: input, shape index: {}]   ;;  %s2079_s5 = inlined_call_operand.vmem [shape: bf16[16,8], index: 5, kind: input, shape index: {}]   ;;  %s2080_s6 = inlined_call_operand.hbm [shape: bf16[2,4,384], index: 6, kind: input, shape index: {}]   ;;  %s2081_s7 = inlined_call_operand.vmem [shape: bf16[128,256], index: 7, kind: input, shape index: {}]   ;;  %s2082_s8 = inlined_call_operand.hbm [shape: f32[1,256], index: 8, kind: input, shape index: {}]   ;;  %s2083_s9 = inlined_call_operand.hbm [shape: bf16[128,128], index: 9, kind: input, shape index: {}]   ;;  %s2084_s10 = inlined_call_operand.vmem [shape: f32[1,128], index: 10, kind: input, shape index: {}]   ;;  %s2085_s11 = inlined_call_operand.hbm [shape: bf16[128,128], index: 11, kind: input, shape index: {}]   ;;  %s2086_s12 = inlined_call_operand.hbm [shape: f32[1,128], index: 12, kind: input, shape index: {}]   ;;  %s2087_s13 = inlined_call_operand.vmem [shape: f32[32,128], index: 13, kind: output, shape index: {}]  }
   0x1   :  { %19 = vsyncpa [#allocation5], 0 }
   0x2   :  { %20 = vsyncpa [#allocation8], 0 }
   0x3   :  { %21 = vsyncpa [#allocation11], 0 }
   0x4   :  { %22 = vsyncpa [#allocation14], 0  ;;  %s1693_s25 = smov [#allocation4]   ;;  %s1694_s27 = smov [#allocation7]  }
   0x5   :  { %s45_s26 = sshll.u32 %s1693_s25, 4  ;;  %s66_s28 = sshll.u32 %s1694_s27, 4  ;;  %s46_s26 = int_to_ptr.vmem [resolvable:$true] %s45_s26  ;;  %s1781_s28 = int_to_ptr.vmem [resolvable:$true] %s66_s28 }
   0x6   :  { %s1507_s14 = scalar_lea.hbm %s2077_s3, 64 }
   0x7   :  { %p1508_p0 = scmp.ne.s32.totalorder %s2077_s3, %s1507_s14  ;;  %p1511_p1 = scmp.lt.u32.totalorder %s1507_s14, %s2077_s3 }
   0x9   :  { %p1513_p2 = pnand %p1511_p1, %p1508_p0 }
   0xb   :  { %1516 = shalt.err (!%p1513_p2)
}
   0xc   :  { %s1517_s19 = scalar_lea.vmem %s46_s26, 64  ;;  %p1522_p4 = scmp.lt.s32.totalorder %s46_s26, %s46_s26 }
   0xd   :  { %p1518_p3 = scmp.ne.s32.totalorder %s46_s26, %s1517_s19  ;;  %p1523_p5 = scmp.lt.s32.totalorder %s1517_s19, %s1517_s19 }
   0xf   :  { %p1524_p6 = por %p1523_p5, %p1522_p4 }
  0x11   :  { %p1525_p7 = pnand %p1524_p6, %p1518_p3 }
  0x13   :  { %1528 = shalt.err (!%p1525_p7)
}
  0x14   :  { %48 = dma.hbm_to_vmem [thread:$0]  %s2077_s3, 64, %s46_s26, [#allocation5]  }
  0x15   :  { %s1529_s24 = scalar_lea.hbm %s2080_s6, 192 }
  0x16   :  { %p1530_p8 = scmp.ne.s32.totalorder %s2080_s6, %s1529_s24  ;;  %p1533_p9 = scmp.lt.u32.totalorder %s1529_s24, %s2080_s6 }
  0x18   :  { %p1535_p10 = pnand %p1533_p9, %p1530_p8 }
  0x1a   :  { %1538 = shalt.err (!%p1535_p10)
}
  0x1b   :  { %s1539_s14 = scalar_lea.vmem %s1781_s28, 192  ;;  %p1544_p12 = scmp.lt.s32.totalorder %s1781_s28, %s1781_s28 }
  0x1c   :  { %p1540_p11 = scmp.ne.s32.totalorder %s1781_s28, %s1539_s14  ;;  %p1545_p13 = scmp.lt.s32.totalorder %s1539_s14, %s1539_s14 }
  0x1e   :  { %p1546_p0 = por %p1545_p13, %p1544_p12 }
  0x20   :  { %p1547_p1 = pnand %p1546_p0, %p1540_p11 }
  0x22   :  { %1550 = shalt.err (!%p1547_p1)
}
  0x23   :  { %s1695_s3 = smov 96   ;;  %s1696_s26 = smov 6  }
  0x24   :  { %72 = dma.hbm_to_vmem [thread:$0]  %s2080_s6, 192, %s1781_s28, [#allocation8], %s1695_s3, %s1695_s3, %s1696_s26  }
  0x25   :  { %s1697_s17 = smov [#allocation10]   ;;  %s1551_s21 = scalar_lea.hbm %s2083_s9, 1024 }
  0x26   :  { %s90_s18 = sshll.u32 %s1697_s17, 4  ;;  %p1552_p2 = scmp.ne.s32.totalorder %s2083_s9, %s1551_s21  ;;  %s91_s18 = int_to_ptr.vmem [resolvable:$true] %s90_s18 }
  0x27   :  { %p1555_p3 = scmp.lt.u32.totalorder %s1551_s21, %s2083_s9 }
  0x29   :  { %p1557_p4 = pnand %p1555_p3, %p1552_p2 }
  0x2b   :  { %1560 = shalt.err (!%p1557_p4)
}
  0x2c   :  { %s1561_s27 = scalar_lea.vmem %s91_s18, 1024  ;;  %p1566_p6 = scmp.lt.s32.totalorder %s91_s18, %s91_s18 }
  0x2d   :  { %p1562_p5 = scmp.ne.s32.totalorder %s91_s18, %s1561_s27  ;;  %p1567_p7 = scmp.lt.s32.totalorder %s1561_s27, %s1561_s27 }
  0x2f   :  { %p1568_p8 = por %p1567_p7, %p1566_p6 }
  0x31   :  { %p1569_p9 = pnand %p1568_p8, %p1562_p5 }
  0x33   :  { %1572 = shalt.err (!%p1569_p9)
}
  0x34   :  { %s1698_s6 = smov 64   ;;  %s1699_s28 = smov 4  }
  0x35   :  { %96 = dma.hbm_to_vmem [thread:$0]  %s2083_s9, 1024, %s91_s18, [#allocation11], %s1698_s6, %s1698_s6, %s1699_s28  }
  0x36   :  { %s1700_s14 = smov [#allocation2]   ;;  %s1573_s16 = scalar_lea.hbm %s2075_s1, 768 }
  0x37   :  { %s30_s3 = sshll.u32 %s1700_s14, 4  ;;  %p1574_p10 = scmp.ne.s32.totalorder %s2075_s1, %s1573_s16  ;;  %s31_s3 = int_to_ptr.vmem [resolvable:$true] %s30_s3 }
  0x38   :  { %p1577_p11 = scmp.lt.u32.totalorder %s1573_s16, %s2075_s1 }
  0x3a   :  { %p1579_p12 = pnand %p1577_p11, %p1574_p10 }
  0x3c   :  { %1582 = shalt.err (!%p1579_p12)
}
  0x3d   :  { %s1583_s22 = scalar_lea.vmem %s31_s3, 768  ;;  %p1588_p0 = scmp.lt.s32.totalorder %s31_s3, %s31_s3 }
  0x3e   :  { %p1584_p13 = scmp.ne.s32.totalorder %s31_s3, %s1583_s22  ;;  %p1589_p1 = scmp.lt.s32.totalorder %s1583_s22, %s1583_s22 }
  0x40   :  { %p1590_p2 = por %p1589_p1, %p1588_p0 }
  0x42   :  { %p1591_p3 = pnand %p1590_p2, %p1584_p13 }
  0x44   :  { %1594 = shalt.err (!%p1591_p3)
}
  0x45   :  { %s1701_s9 = smov 384   ;;  %s1702_s18 = smov 24  }
  0x46   :  { %36 = dma.hbm_to_vmem [thread:$0]  %s2075_s1, 768, %s31_s3, [#allocation3], %s1701_s9, %s1701_s9, %s1702_s18  }
  0x47   :  { %s1703_s25 = smov [#allocation6]   ;;  %s1704_s29 = smov [#allocation9]  }
  0x48   :  { %s55_s27 = sshll.u32 %s1703_s25, 4  ;;  %s81_s30 = sshll.u32 %s1704_s29, 4  ;;  %s56_s27 = int_to_ptr.vmem [resolvable:$true] %s55_s27  ;;  %s82_s30 = int_to_ptr.vmem [resolvable:$true] %s81_s30 }
  0x49   :  { %s1595_s15 = scalar_lea.hbm %s2078_s4, 64 }
  0x4a   :  { %p1596_p4 = scmp.ne.s32.totalorder %s2078_s4, %s1595_s15  ;;  %p1599_p5 = scmp.lt.u32.totalorder %s1595_s15, %s2078_s4 }
  0x4c   :  { %p1601_p6 = pnand %p1599_p5, %p1596_p4 }
  0x4e   :  { %1604 = shalt.err (!%p1601_p6)
}
  0x4f   :  { %s1605_s1 = scalar_lea.vmem %s56_s27, 64  ;;  %p1610_p8 = scmp.lt.s32.totalorder %s56_s27, %s56_s27 }
  0x50   :  { %p1606_p7 = scmp.ne.s32.totalorder %s56_s27, %s1605_s1  ;;  %p1611_p9 = scmp.lt.s32.totalorder %s1605_s1, %s1605_s1 }
  0x52   :  { %p1612_p10 = por %p1611_p9, %p1610_p8 }
  0x54   :  { %p1613_p11 = pnand %p1612_p10, %p1606_p7 }
  0x56   :  { %1616 = shalt.err (!%p1613_p11)
}
  0x57   :  { %58 = dma.hbm_to_vmem [thread:$0]  %s2078_s4, 64, %s56_s27, [#allocation5]  }
  0x58   :  { %s1617_s18 = scalar_lea.hbm %s2082_s8, 32 }
  0x59   :  { %p1618_p12 = scmp.ne.s32.totalorder %s2082_s8, %s1617_s18  ;;  %p1621_p13 = scmp.lt.u32.totalorder %s1617_s18, %s2082_s8 }
  0x5b   :  { %p1623_p0 = pnand %p1621_p13, %p1618_p12 }
  0x5d   :  { %1626 = shalt.err (!%p1623_p0)
}
  0x5e   :  { %s1627_s14 = scalar_lea.vmem %s82_s30, 32  ;;  %p1632_p2 = scmp.lt.s32.totalorder %s82_s30, %s82_s30 }
  0x5f   :  { %p1628_p1 = scmp.ne.s32.totalorder %s82_s30, %s1627_s14  ;;  %p1633_p3 = scmp.lt.s32.totalorder %s1627_s14, %s1627_s14 }
  0x61   :  { %p1634_p4 = por %p1633_p3, %p1632_p2 }
  0x63   :  { %p1635_p5 = pnand %p1634_p4, %p1628_p1 }
  0x65   :  { %1638 = shalt.err (!%p1635_p5)
}
  0x66   :  { %84 = dma.hbm_to_vmem [thread:$0]  %s2082_s8, 32, %s82_s30, [#allocation8]  }
  0x67   :  { %s1705_s26 = smov [#allocation12]   ;;  %s1706_s16 = smov [#allocation13]  }
  0x68   :  { %s104_s15 = sshll.u32 %s1705_s26, 4  ;;  %s117_s17 = sshll.u32 %s1706_s16, 4  ;;  %s105_s15 = int_to_ptr.vmem [resolvable:$true] %s104_s15  ;;  %s118_s17 = int_to_ptr.vmem [resolvable:$true] %s117_s17 }
  0x69   :  { %s1639_s1 = scalar_lea.hbm %s2085_s11, 1024 }
  0x6a   :  { %p1640_p6 = scmp.ne.s32.totalorder %s2085_s11, %s1639_s1  ;;  %p1643_p7 = scmp.lt.u32.totalorder %s1639_s1, %s2085_s11 }
  0x6c   :  { %p1645_p8 = pnand %p1643_p7, %p1640_p6 }
  0x6e   :  { %1648 = shalt.err (!%p1645_p8)
}
  0x6f   :  { %s1649_s8 = scalar_lea.vmem %s105_s15, 1024  ;;  %p1654_p10 = scmp.lt.s32.totalorder %s105_s15, %s105_s15 }
  0x70   :  { %p1650_p9 = scmp.ne.s32.totalorder %s105_s15, %s1649_s8  ;;  %p1655_p11 = scmp.lt.s32.totalorder %s1649_s8, %s1649_s8 }
  0x72   :  { %p1656_p12 = por %p1655_p11, %p1654_p10 }
  0x74   :  { %p1657_p13 = pnand %p1656_p12, %p1650_p9 }
  0x76   :  { %1660 = shalt.err (!%p1657_p13)
}
  0x77   :  { %110 = dma.hbm_to_vmem [thread:$0]  %s2085_s11, 1024, %s105_s15, [#allocation11], %s1698_s6, %s1698_s6, %s1699_s28  }
  0x78   :  { %s1661_s25 = scalar_lea.hbm %s2086_s12, 16 }
  0x79   :  { %p1662_p0 = scmp.ne.s32.totalorder %s2086_s12, %s1661_s25  ;;  %p1665_p1 = scmp.lt.u32.totalorder %s1661_s25, %s2086_s12 }
  0x7b   :  { %p1667_p2 = pnand %p1665_p1, %p1662_p0 }
  0x7d   :  { %1670 = shalt.err (!%p1667_p2)
}
  0x7e   :  { %s1671_s26 = scalar_lea.vmem %s118_s17, 16  ;;  %s1675_s16 = scalar_lea.vmem %s118_s17, 32 }
  0x7f   :  { %p1672_p3 = scmp.ne.s32.totalorder %s118_s17, %s1671_s26  ;;  %p1676_p4 = scmp.lt.s32.totalorder %s118_s17, %s118_s17 }
  0x80   :  { %p1677_p5 = scmp.lt.s32.totalorder %s1675_s16, %s1671_s26 }
  0x82   :  { %p1678_p6 = por %p1677_p5, %p1676_p4 }
  0x84   :  { %p1679_p7 = pnand %p1678_p6, %p1672_p3 }
  0x86   :  { %1682 = shalt.err (!%p1679_p7)
}
  0x87   :  { %120 = dma.hbm_to_vmem [thread:$0]  %s2086_s12, 16, %s118_s17, [#allocation14]  }
  0x88   :  { %1683 = dma.done.wait [#allocation3], 768  }
  0x89   :  { %1684 = vsyncadd [#allocation3], 4294966528 }
  0x8a   :  { %1685 = dma.done.wait [#allocation5], 128  }
  0x8b   :  { %1686 = vsyncadd [#allocation5], 4294967168 }
  0x8c   :  { %1687 = dma.done.wait [#allocation8], 224  }
  0x8d   :  { %1688 = vsyncadd [#allocation8], 4294967072 }
  0x8e   :  { %1689 = dma.done.wait [#allocation11], 2048  }
  0x8f   :  { %1690 = vsyncadd [#allocation11], 4294965248 }
  0x90   :  { %1691 = dma.done.wait [#allocation14], 16  }
  0x91   :  { %1692 = vsyncadd [#allocation14], 4294967280  ;;  %v169_v0 = vlaneseq  ;;  %v1707_v1 = vmov 1983009808   ;;  %v1708_v3 = vmov 0   ;;  %vm188_vm0 = vcmask 1041408  }
  0x92   :  { %v167_v2 = vunpack.c.l.s4 %v1707_v1  ;;  %230 = vmatprep.mubr.bf16.mxu0 %v1708_v3  ;;  %v154_v7 = vld [vmem:[#allocation7] sm:$0x3f]  ;;  %v155_v10 = vld [vmem:[#allocation7 + $0x6] sm:$0x3f]  ;;  %v147_v12 = vld [vmem:[%s2074_s0 + $0x8] sm:$0xff]  ;;  %vm181_vm1 = vcmask 31744  }
  0x93   :  { %v1890_v4 = vshrl.u32 %v169_v0, 7  ;;  %v165_v8 = vcombine.high %v154_v7, %v154_v7  ;;  %v146_v11 = vld [vmem:[%s2074_s0] sm:$0xff]  ;;  %v151_v21 = vld [vmem:[%s2074_s0 + $0x28] sm:$0xff]  ;;  %v315_v23 = vcombine.high %v155_v10, %v155_v10  ;;  %v148_v26 = vld [vmem:[%s2074_s0 + $0x10] sm:$0xff]  ;;  %v1709_v33 = vmov 0.0  }
  0x94   :  { %v168_v5 = vunpack.c.0.s8 %v167_v2  ;;  %v162_v17 = vpack.c.bf16 %v147_v12, %v146_v11  ;;  %v150_v20 = vld [vmem:[%s2074_s0 + $0x20] sm:$0xff]  ;;  %v149_v27 = vld [vmem:[%s2074_s0 + $0x18] sm:$0xff]  ;;  %v152_v30 = vld [vmem:[%s2074_s0 + $0x30] sm:$0xff]  ;;  %1320 = vmatprep.subr.bf16.mxu1 %v1709_v33  ;;  %vm1710_vm2 = vmmov 0   ;;  %vm463_vm3 = vcmask 130048  }
  0x95   :  { %v163_v22 = vpack.c.bf16 %v151_v21, %v150_v20  ;;  %v312_v28 = vpack.c.bf16 %v149_v27, %v148_v26  ;;  %v153_v31 = vld [vmem:[%s2074_s0 + $0x38] sm:$0xff]  ;;  %1322 = vmatprep.mubr.msk.bf16.mxu1 %vm1710_vm2, %v1709_v33  ;;  %v156_v34 = vld [vmem:[#allocation2] sm:$0xff]  ;;  %v460_v43 = vld [vmem:[#allocation4] sm:$0xf]  ;;  %vm724_vm4 = vcmask 1043456   ;;  %vm720_vm5 = vcmask 64512  }
  0x96   :  { %v171_v6 = vsub.s32 %v168_v5, %v1890_v4  ;;  %v313_v32 = vpack.c.bf16 %v153_v31, %v152_v30  ;;  %v159_v36 = vld [vmem:[#allocation2 + $0x18] sm:$0xff]  ;;  %v1452_v55 = vld [vmem:[%s2081_s7 + $0x4] ss:$8 sps:$4 sm:$0xff]   ;;  %v1450_v56 = vld [vmem:[%s2081_s7] ss:$8 sps:$4 sm:$0xff]  }
  0x97   :  { %v1455_v57 = vld [vmem:[%s2081_s7 + $0x14] ss:$8 sps:$4 sm:$0xff]   ;;  %v1453_v58 = vld [vmem:[%s2081_s7 + $0x10] ss:$8 sps:$4 sm:$0xff]   ;;  %v1458_v59 = vld [vmem:[%s2081_s7 + $0x24] ss:$8 sps:$4 sm:$0xff]  }
  0x98   :  { %v172_v9 = vrot.slane %v154_v7, %v171_v6  ;;  %v179_v15 = vrot.slane %v165_v8, %v171_v6  ;;  %v322_v16 = vrot.slane %v155_v10, %v171_v6  ;;  %v329_v25 = vrot.slane %v315_v23, %v171_v6  ;;  %v1456_v60 = vld [vmem:[%s2081_s7 + $0x20] ss:$8 sps:$4 sm:$0xff]   ;;  %v1461_v61 = vld [vmem:[%s2081_s7 + $0x34] ss:$8 sps:$4 sm:$0xff]   ;;  %v1459_v62 = vld [vmem:[%s2081_s7 + $0x30] ss:$8 sps:$4 sm:$0xff]  }
  0x99   :  { %v1464_v63 = vld [vmem:[%s2081_s7 + $0x44] ss:$8 sps:$4 sm:$0xff]   ;;  %v1462_v0 = vld [vmem:[%s2081_s7 + $0x40] ss:$8 sps:$4 sm:$0xff]   ;;  %v1467_v1 = vld [vmem:[%s2081_s7 + $0x54] ss:$8 sps:$4 sm:$0xff]  }
  0x9a   :  { %v180_v13 = vcombine.high %v172_v9, %v172_v9  ;;  %v190_v14 = vsel %vm188_vm0, %v172_v9, 0  ;;  %v196_v18 = vsel %vm188_vm0, %v179_v15, 0  ;;  %v330_v19 = vcombine.high %v322_v16, %v322_v16  ;;  %v1465_v2 = vld [vmem:[%s2081_s7 + $0x50] ss:$8 sps:$4 sm:$0xff]   ;;  %v1468_v5 = vld [vmem:[%s2081_s7 + $0x60] ss:$8 sps:$4 sm:$0xff]  }
  0x9b   :  { %v338_v24 = vsel %vm188_vm0, %v322_v16, 0  ;;  %v344_v29 = vsel %vm188_vm0, %v329_v25, 0  ;;  %v1473_v6 = vld [vmem:[%s2081_s7 + $0x74] ss:$8 sps:$4 sm:$0xff]   ;;  %v1471_v7 = vld [vmem:[%s2081_s7 + $0x70] ss:$8 sps:$4 sm:$0xff]  }
  0x9c   :  { %1220 = vmatprep.subr.msk.bf16.mxu0 %vm188_vm0, %v180_v13  ;;  %v461_v8 = vld [vmem:[%s2076_s2] sm:$0xff] }
  0x9d   :  { %199 = vmatpush1.bf16.msra.mxu0 %v190_v14 }
  0x9e   :  { %1428 = vmatprep.subr.msk.bf16.mxu0 %vm188_vm0, %v179_v15 }
  0xa0   :  { %1221 = vmatmul.mubr.msk.bf16.vlgmr.msra.gmra.mrb[0].mxu0 %vm181_vm1, %v162_v17 }
  0xa1   :  { %1309 = vmatpush3.bf16.msra.mxu0 %v196_v18  ;;  %240 = vmatprep.mubr.bf16.mxu0 %v1708_v3 }
  0xa2   :  { %1225 = vmatprep.subr.msk.bf16.mxu0 %vm188_vm0, %v330_v19 }
  0xa8   :  { %1222 = vmatmul.mubr.msk.bf16.gmra.mrb[4].mxu0 %vm181_vm1, %v163_v22 }
  0xa9   :  { %1310 = vmatprep.mubr.msk.bf16.mxu0 %vm181_vm1, %v162_v17 }
  0xb0   :  { %1311 = vmatmul.mubr.msk.bf16.vlgmr.msra.gmra.mrb[8].mxu0 %vm181_vm1, %v163_v22 }
  0xb1   :  { %347 = vmatpush1.bf16.msra.mxu0 %v338_v24  ;;  %378 = vmatprep.mubr.bf16.mxu0 %v1708_v3 }
  0xb2   :  { %1429 = vmatprep.subr.msk.bf16.mxu0 %vm188_vm0, %v329_v25 }
  0xb8   :  { %1226 = vmatmul.mubr.msk.bf16.vlgmr.msra.gmra.mrb[0].mxu0 %vm181_vm1, %v312_v28 }
  0xb9   :  { %388 = vmatprep.mubr.bf16.mxu0 %v1708_v3  ;;  %1315 = vmatpush3.bf16.msra.mxu0 %v344_v29 }
  0xba   :  { %675 = vmatprep.subr.bf16.mxu0 %v1452_v55 }
  0xc0   :  { %1227 = vmatmul.mubr.msk.bf16.gmra.mrb[4].mxu0 %vm181_vm1, %v313_v32 }
  0xc1   :  { %1316 = vmatprep.mubr.msk.bf16.mxu0 %vm181_vm1, %v312_v28 }
  0xc8   :  { %1317 = vmatmul.mubr.msk.bf16.vlgmr.msra.gmra.mrb[8].mxu0 %vm181_vm1, %v313_v32 }
  0xc9   :  { %707 = vmatprep.mubr.bf16.mxu0 %v1708_v3  ;;  %676 = vmatpush1.bf16.msra.mxu0 %v1450_v56  ;;  %v1470_v3 = vld [vmem:[%s2081_s7 + $0x64] ss:$8 sps:$4 sm:$0xff]  }
  0xca   :  { %677 = vmatprep.subr.bf16.mxu0 %v1455_v57 }
  0xcd   :  { %678 = vmatpush1.bf16.msra.mxu0 %v1453_v58 }
  0xce   :  { %679 = vmatprep.subr.bf16.mxu0 %v1458_v59  ;;  %v718_v59 = vld [vmem:[#allocation6] sm:$0xf] }
  0xd1   :  { %680 = vmatpush1.bf16.msra.mxu0 %v1456_v60 }
  0xd2   :  { %681 = vmatprep.subr.bf16.mxu0 %v1461_v61  ;;  %v1474_v61 = vld [vmem:[#allocation10] sm:$0xff]  }
  0xd5   :  { %682 = vmatpush1.bf16.msra.mxu0 %v1459_v62  ;;  %v1475_v62 = vld [vmem:[#allocation10 + $0x8] sm:$0xff]  }
  0xd6   :  { %683 = vmatprep.subr.bf16.mxu0 %v1464_v63  ;;  %v1476_v63 = vld [vmem:[#allocation10 + $0x10] sm:$0xff]  }
  0xd9   :  { %684 = vmatpush1.bf16.msra.mxu0 %v1462_v0  ;;  %v1477_v0 = vld [vmem:[#allocation10 + $0x18] sm:$0xff]  }
  0xda   :  { %685 = vmatprep.subr.bf16.mxu0 %v1467_v1  ;;  %v1478_v1 = vld [vmem:[#allocation10 + $0x20] sm:$0xff]  }
  0xdd   :  { %686 = vmatpush1.bf16.msra.mxu0 %v1465_v2  ;;  %v1479_v2 = vld [vmem:[#allocation10 + $0x28] sm:$0xff]  }
  0xde   :  { %687 = vmatprep.subr.bf16.mxu0 %v1470_v3  ;;  %v1480_v3 = vld [vmem:[#allocation10 + $0x30] sm:$0xff]  }
  0xe1   :  { %688 = vmatpush1.bf16.msra.mxu0 %v1468_v5  ;;  %v1481_v5 = vld [vmem:[#allocation10 + $0x38] sm:$0xff]  }
  0xe2   :  { %689 = vmatprep.subr.bf16.mxu0 %v1473_v6  ;;  %v591_v6 = vsub.s32 1, %v1890_v4 }
  0xe5   :  { %690 = vmatpush1.bf16.msra.mxu0 %v1471_v7 }
  0xe6   :  { %1364 = vmatprep.subr.bf16.mxu0 %v1709_v33 }
 0x18b   :  { %v380_v35 = vpop.f32.mrb[0].mxu0 }
 0x18c   :  { %v1936_v37 = vpop.f32.mrb[1].mxu0  ;;  %v1396_v39 = vadd.f32 %v380_v35, %v156_v34 }
 0x18d   :  { %v384_v38 = vpop.f32.mrb[2].mxu0 }
 0x18e   :  { %v1398_v40 = vadd.f32 %v384_v38, %v159_v36  ;;  %v1938_v41 = vpop.f32.mrb[3].mxu0 }
 0x190   :  { %v462_v42 = vpack.c.bf16 %v1398_v40, %v1396_v39  ;;  %v587_v40 = vsub.s32 0, %v1890_v4 }
 0x192   :  { %1321 = vmatpush3.bf16.msra.mxu1 %v462_v42  ;;  %v583_v42 = vld [vmem:[#allocation9] sm:$0x3] }
 0x193   :  { %v390_v44 = vpop.f32.mrb[4].mxu0  ;;  %1326 = vmatprep.subr.bf16.mxu1 %v1709_v33  ;;  %v592_v7 = vrot.slane %v583_v42, %v591_v6  ;;  %v160_v6 = vld [vmem:[#allocation2 + $0x20] sm:$0xff] }
 0x194   :  { %v1941_v45 = vpop.f32.mrb[5].mxu0  ;;  %v1400_v47 = vadd.f32 %v390_v44, %v156_v34 }
 0x195   :  { %v394_v46 = vpop.f32.mrb[6].mxu0  ;;  %1323 = vmatmul.mubr.msk.bf16.vlgmr.msra.gmra.mrb[0].mxu1 %vm463_vm3, %v460_v43 }
 0x196   :  { %v1402_v48 = vadd.f32 %v394_v46, %v159_v36  ;;  %v1944_v49 = vpop.f32.mrb[7].mxu0  ;;  %1328 = vmatprep.mubr.msk.bf16.mxu1 %vm1710_vm2, %v1709_v33 }
 0x198   :  { %v516_v50 = vpack.c.bf16 %v1402_v48, %v1400_v47 }
 0x19a   :  { %1327 = vmatpush3.bf16.msra.mxu1 %v516_v50 }
 0x19b   :  { %v1948_v51 = vpop.f32.mrb[8].mxu0  ;;  %1332 = vmatprep.subr.bf16.mxu1 %v1709_v33 }
 0x19c   :  { %v1951_v52 = vpop.f32.mrb[9].mxu0 }
 0x19d   :  { %v1953_v53 = vpop.f32.mrb[10].mxu0  ;;  %1329 = vmatmul.mubr.msk.bf16.vlgmr.msra.gmra.mrb[4].mxu1 %vm463_vm3, %v460_v43  ;;  %v588_v43 = vrot.slane %v583_v42, %v587_v40 }
 0x19e   :  { %v1956_v54 = vpop.f32.mrb[11].mxu0  ;;  %1334 = vmatprep.mubr.msk.bf16.mxu1 %vm1710_vm2, %v1709_v33 }
 0x268   :  { %v501_v9 = vpop.f32.mrb[0].mxu1 }
 0x269   :  { %v502_v10 = vadd.f32 %v501_v9, %v461_v8  ;;  %v1324_v11 = vpop.f32.mrb[1].mxu1 }
 0x26a   :  { %v504_v12 = vpop.f32.mrb[2].mxu1 }
 0x26b   :  { %v507_v13 = vmul.f32 %v502_v10, %v502_v10  ;;  %v1325_v14 = vpop.f32.mrb[3].mxu1 }
 0x26d   :  { %v508_v15 = vmul.f32 %v507_v13, %v502_v10 }
 0x26f   :  { %v509_v16 = vmul.f32 0.044715, %v508_v15 }
 0x270   :  { %v551_v17 = vpop.f32.mrb[4].mxu1 }
 0x271   :  { %v510_v18 = vadd.f32 %v509_v16, %v502_v10  ;;  %v552_v19 = vadd.f32 %v551_v17, %v461_v8  ;;  %v1330_v20 = vpop.f32.mrb[5].mxu1 }
 0x272   :  { %v554_v21 = vpop.f32.mrb[6].mxu1 }
 0x273   :  { %v511_v22 = vmul.f32 0.7978846, %v510_v18  ;;  %v557_v23 = vmul.f32 %v552_v19, %v552_v19  ;;  %v1331_v24 = vpop.f32.mrb[7].mxu1 }
 0x275   :  { %v558_v25 = vmul.f32 %v557_v23, %v552_v19  ;;  %1491 = vtanh.f32 %v511_v22 }
 0x277   :  { %v559_v26 = vmul.f32 0.044715, %v558_v25 }
 0x279   :  { %v560_v27 = vadd.f32 %v559_v26, %v552_v19 }
 0x27b   :  { %v561_v28 = vmul.f32 0.7978846, %v560_v27 }
 0x27d   :  { %1493 = vtanh.f32 %v561_v28 }
 0x27f   :  { %v1492_v29 = vpop.eup %1491 }
 0x280   :  { %v513_v30 = vadd.f32 1.0, %v1492_v29 }
 0x282   :  { %v514_v32 = vmul.f32 0.5, %v513_v30 }
 0x284   :  { %v2012_v36 = vmul.f32 %v514_v32, %v502_v10 }
 0x287   :  { %v1494_v31 = vpop.eup %1493 }
 0x288   :  { %v563_v34 = vadd.f32 1.0, %v1494_v31 }
 0x28a   :  { %v564_v35 = vmul.f32 0.5, %v563_v34 }
 0x28c   :  { %v2014_v38 = vmul.f32 %v564_v35, %v552_v19 }
 0x28e   :  { %v566_v39 = vpack.c.bf16 %v2014_v38, %v2012_v36 }
 0x290   :  { %708 = vmatmul.mubr.bf16.vlgmr.msra.gmra.mrb[12].mxu0 %v566_v39 }
 0x291   :  { %1366 = vmatprep.mubr.msk.bf16.mxu0 %vm1710_vm2, %v1709_v33 }
 0x363   :  { %v709_v44 = vpop.f32.mrb[12].mxu0 }
 0x364   :  { %v710_v46 = vadd.f32 %v709_v44, %v588_v43  ;;  %v711_v47 = vpop.f32.mrb[13].mxu0 }
 0x365   :  { %v713_v48 = vpop.f32.mrb[14].mxu0  ;;  %v712_v8 = vadd.f32 %v711_v47, %v592_v7 }
 0x366   :  { %v719_v50 = vpack.c.bf16 %v710_v46, %v710_v46  ;;  %v714_v55 = vadd.f32 %v713_v48, %v588_v43  ;;  %v715_v56 = vpop.f32.mrb[15].mxu0  ;;  %v1250_v46 = vld [vmem:[%s2084_s10] ss:$0 sm:$0xff] }
 0x367   :  { %v716_v16 = vadd.f32 %v715_v56, %v592_v7 }
 0x368   :  { %v726_v57 = vsel %vm724_vm4, %v719_v50, 0  ;;  %v777_v58 = vpack.c.bf16 %v714_v55, %v714_v55 }
 0x369   :  { %1333 = vmatpush3.bf16.msra.mxu1 %v726_v57 }
 0x36a   :  { %1338 = vmatprep.subr.bf16.mxu1 %v1709_v33  ;;  %v779_v60 = vsel %vm724_vm4, %v777_v58, 0 }
 0x36c   :  { %1335 = vmatmul.mubr.msk.bf16.vlgmr.msra.gmra.mrb[8].mxu1 %vm720_vm5, %v718_v59 }
 0x36d   :  { %1339 = vmatpush3.bf16.msra.mxu1 %v779_v60  ;;  %1340 = vmatprep.mubr.msk.bf16.mxu1 %vm1710_vm2, %v1709_v33 }
 0x36e   :  { %1344 = vmatprep.subr.bf16.mxu1 %v1709_v33 }
 0x374   :  { %1341 = vmatmul.mubr.msk.bf16.vlgmr.msra.gmra.mrb[12].mxu1 %vm720_vm5, %v718_v59 }
 0x375   :  { %1360 = vmatprep.mubr.msk.bf16.mxu1 %vm1710_vm2, %v1709_v33  ;;  %1345 = vmatpush3.bf16.msra.mxu1 %v1474_v61  ;;  %v1483_v61 = vld [vmem:[#allocation12] sm:$0xff]  }
 0x376   :  { %1346 = vmatprep.subr.bf16.mxu1 %v1709_v33 }
 0x379   :  { %1347 = vmatpush3.bf16.msra.mxu1 %v1475_v62  ;;  %v1484_v62 = vld [vmem:[#allocation12 + $0x8] sm:$0xff]  }
 0x37a   :  { %1348 = vmatprep.subr.bf16.mxu1 %v1709_v33 }
 0x37d   :  { %1349 = vmatpush3.bf16.msra.mxu1 %v1476_v63  ;;  %v1485_v63 = vld [vmem:[#allocation12 + $0x10] sm:$0xff]  }
 0x37e   :  { %1350 = vmatprep.subr.bf16.mxu1 %v1709_v33 }
 0x381   :  { %1351 = vmatpush3.bf16.msra.mxu1 %v1477_v0  ;;  %v1486_v0 = vld [vmem:[#allocation12 + $0x18] sm:$0xff]  }
 0x382   :  { %1352 = vmatprep.subr.bf16.mxu1 %v1709_v33 }
 0x385   :  { %1353 = vmatpush3.bf16.msra.mxu1 %v1478_v1  ;;  %v1487_v1 = vld [vmem:[#allocation12 + $0x20] sm:$0xff]  }
 0x386   :  { %1354 = vmatprep.subr.bf16.mxu1 %v1709_v33 }
 0x389   :  { %1355 = vmatpush3.bf16.msra.mxu1 %v1479_v2  ;;  %v1488_v2 = vld [vmem:[#allocation12 + $0x28] sm:$0xff]  }
 0x38a   :  { %1356 = vmatprep.subr.bf16.mxu1 %v1709_v33 }
 0x38d   :  { %1357 = vmatpush3.bf16.msra.mxu1 %v1480_v3  ;;  %v1490_v3 = vld [vmem:[#allocation12 + $0x38] sm:$0xff]  }
 0x38e   :  { %1358 = vmatprep.subr.bf16.mxu1 %v1709_v33 }
 0x391   :  { %1359 = vmatpush3.bf16.msra.mxu1 %v1481_v5  ;;  %v157_v5 = vld [vmem:[#allocation2 + $0x8] sm:$0xff] }
 0x392   :  { %1376 = vmatprep.subr.bf16.mxu1 %v1483_v61  ;;  %v1397_v7 = vadd.f32 %v1936_v37, %v157_v5 }
 0x43f   :  { %v762_v9 = vpop.f32.mrb[8].mxu1 }
 0x440   :  { %v763_v10 = vadd.f32 %v762_v9, %v712_v8  ;;  %v1336_v11 = vpop.f32.mrb[9].mxu1  ;;  %v1399_v9 = vadd.f32 %v1938_v41, %v160_v6 }
 0x441   :  { %v765_v12 = vpop.f32.mrb[10].mxu1 }
 0x442   :  { %v768_v13 = vmul.f32 %v763_v10, %v763_v10  ;;  %v1337_v14 = vpop.f32.mrb[11].mxu1 }
 0x444   :  { %v769_v15 = vmul.f32 %v768_v13, %v763_v10 }
 0x446   :  { %v770_v17 = vmul.f32 0.044715, %v769_v15 }
 0x447   :  { %v815_v18 = vpop.f32.mrb[12].mxu1 }
 0x448   :  { %v771_v19 = vadd.f32 %v770_v17, %v763_v10  ;;  %v816_v20 = vadd.f32 %v815_v18, %v716_v16  ;;  %v1342_v21 = vpop.f32.mrb[13].mxu1  ;;  %v1401_v18 = vadd.f32 %v1941_v45, %v157_v5  ;;  %v1262_v5 = vld [vmem:[#allocation13] ss:$0 sm:$0xff] }
 0x449   :  { %v818_v22 = vpop.f32.mrb[14].mxu1 }
 0x44a   :  { %v772_v23 = vmul.f32 0.7978846, %v771_v19  ;;  %v821_v24 = vmul.f32 %v816_v20, %v816_v20  ;;  %v1343_v25 = vpop.f32.mrb[15].mxu1  ;;  %v1403_v22 = vadd.f32 %v1944_v49, %v160_v6 }
 0x44c   :  { %1495 = vtanh.f32 %v772_v23  ;;  %v822_v4 = vmul.f32 %v821_v24, %v816_v20 }
 0x44e   :  { %v823_v26 = vmul.f32 0.044715, %v822_v4 }
 0x450   :  { %v824_v27 = vadd.f32 %v823_v26, %v816_v20 }
 0x452   :  { %v825_v28 = vmul.f32 0.7978846, %v824_v27 }
 0x454   :  { %1497 = vtanh.f32 %v825_v28 }
 0x456   :  { %v1496_v29 = vpop.eup %1495 }
 0x457   :  { %v774_v30 = vadd.f32 1.0, %v1496_v29 }
 0x459   :  { %v775_v31 = vmul.f32 0.5, %v774_v30 }
 0x45b   :  { %v776_v35 = vmul.f32 %v775_v31, %v763_v10 }
 0x45d   :  { %v830_v42 = vadd.f32 %v776_v35, %v2012_v36  ;;  %v1482_v36 = vld [vmem:[%s2079_s5] sm:$0xff]  }
 0x45e   :  { %v1498_v32 = vpop.eup %1497 }
 0x45f   :  { %v827_v34 = vadd.f32 1.0, %v1498_v32 }
 0x461   :  { %v828_v39 = vmul.f32 0.5, %v827_v34 }
 0x463   :  { %v829_v40 = vmul.f32 %v828_v39, %v816_v20 }
 0x465   :  { %v831_v43 = vadd.f32 %v829_v40, %v2014_v38 }
 0x467   :  { %v832_v44 = vpack.c.bf16 %v831_v43, %v830_v42 }
 0x469   :  { %1361 = vmatmul.mubr.bf16.vlgmr.msra.gmra.mrb[16].mxu1 %v832_v44 }
 0x46a   :  { %1377 = vmatpush3.bf16.msra.mxu1 %v1483_v61 }
 0x46b   :  { %1378 = vmatprep.subr.bf16.mxu1 %v1484_v62 }
 0x46e   :  { %1379 = vmatpush3.bf16.msra.mxu1 %v1484_v62 }
 0x46f   :  { %1380 = vmatprep.subr.bf16.mxu1 %v1485_v63 }
 0x472   :  { %1381 = vmatpush3.bf16.msra.mxu1 %v1485_v63 }
 0x473   :  { %1382 = vmatprep.subr.bf16.mxu1 %v1486_v0 }
 0x476   :  { %1383 = vmatpush3.bf16.msra.mxu1 %v1486_v0 }
 0x477   :  { %1384 = vmatprep.subr.bf16.mxu1 %v1487_v1 }
 0x47a   :  { %1385 = vmatpush3.bf16.msra.mxu1 %v1487_v1  ;;  %v161_v1 = vld [vmem:[#allocation2 + $0x28] sm:$0xff] }
 0x47b   :  { %1386 = vmatprep.subr.bf16.mxu1 %v1488_v2 }
 0x47e   :  { %1387 = vmatpush3.bf16.msra.mxu1 %v1488_v2  ;;  %v158_v2 = vld [vmem:[#allocation2 + $0x10] sm:$0xff] }
 0x47f   :  { %v1404_v6 = vadd.f32 %v1948_v51, %v158_v2 }
 0x53c   :  { %v938_v47 = vpop.f32.mrb[16].mxu1 }
 0x53d   :  { %v939_v48 = vadd.f32 %v1250_v46, %v938_v47  ;;  %v1362_v50 = vpop.f32.mrb[17].mxu1 }
 0x53e   :  { %v941_v55 = vpop.f32.mrb[18].mxu1 }
 0x53f   :  { %v947_v56 = vpack.c.bf16 %v939_v48, %v939_v48  ;;  %v942_v57 = vadd.f32 %v1250_v46, %v941_v55  ;;  %v1363_v58 = vpop.f32.mrb[19].mxu1 }
 0x541   :  { %v957_v59 = vsel %vm724_vm4, %v947_v56, 0  ;;  %v1018_v60 = vpack.c.bf16 %v942_v57, %v942_v57 }
 0x542   :  { %1365 = vmatpush3.bf16.msra.mxu0 %v957_v59 }
 0x543   :  { %1370 = vmatprep.subr.bf16.mxu0 %v1709_v33  ;;  %v1020_v38 = vsel %vm724_vm4, %v1018_v60, 0 }
 0x545   :  { %1367 = vmatmul.mubr.msk.bf16.vlgmr.msra.gmra.mrb[16].mxu0 %vm720_vm5, %v1482_v36 }
 0x546   :  { %1371 = vmatpush3.bf16.msra.mxu0 %v1020_v38  ;;  %1372 = vmatprep.mubr.msk.bf16.mxu0 %vm1710_vm2, %v1709_v33  ;;  %v1489_v33 = vld [vmem:[#allocation12 + $0x30] sm:$0xff]  }
 0x547   :  { %1388 = vmatprep.subr.bf16.mxu1 %v1489_v33 }
 0x548   :  { %1389 = vmatpush3.bf16.msra.mxu1 %v1489_v33  ;;  %v1410_v33 = vadd.f32 %v1953_v53, %v161_v1 }
 0x549   :  { %1390 = vmatprep.subr.bf16.mxu1 %v1490_v3 }
 0x54c   :  { %1391 = vmatpush3.bf16.msra.mxu1 %v1490_v3  ;;  %v1413_v3 = vadd.f32 %v1956_v54, %v161_v1 }
 0x54d   :  { %1373 = vmatmul.mubr.msk.bf16.vlgmr.msra.gmra.mrb[20].mxu0 %vm720_vm5, %v1482_v36 }
 0x618   :  { %v993_v8 = vpop.f32.mrb[16].mxu0 }
 0x619   :  { %v994_v10 = vadd.f32 %v1397_v7, %v993_v8  ;;  %v1368_v11 = vpop.f32.mrb[17].mxu0  ;;  %v1407_v7 = vadd.f32 %v1951_v52, %v158_v2 }
 0x61a   :  { %v996_v12 = vpop.f32.mrb[18].mxu0  ;;  %v1411_v11 = vadd.f32 %v1410_v33, %v1262_v5 }
 0x61b   :  { %v1000_v13 = vmul.f32 %v994_v10, %v994_v10  ;;  %v997_v14 = vadd.f32 %v1399_v9, %v996_v12  ;;  %v1369_v15 = vpop.f32.mrb[19].mxu0 }
 0x61d   :  { %v1002_v16 = vmul.f32 %v1000_v13, %v994_v10  ;;  %v1001_v17 = vmul.f32 %v997_v14, %v997_v14 }
 0x61f   :  { %v1004_v19 = vmul.f32 0.044715, %v1002_v16  ;;  %v1003_v20 = vmul.f32 %v1001_v17, %v997_v14 }
 0x620   :  { %v1056_v21 = vpop.f32.mrb[20].mxu0 }
 0x621   :  { %v1006_v23 = vadd.f32 %v1004_v19, %v994_v10  ;;  %v1005_v37 = vmul.f32 0.044715, %v1003_v20  ;;  %v1057_v24 = vadd.f32 %v1401_v18, %v1056_v21  ;;  %v1374_v25 = vpop.f32.mrb[21].mxu0 }
 0x622   :  { %v1059_v41 = vpop.f32.mrb[22].mxu0 }
 0x623   :  { %v1008_v4 = vmul.f32 0.7978846, %v1006_v23  ;;  %v1007_v26 = vadd.f32 %v1005_v37, %v997_v14  ;;  %v1063_v27 = vmul.f32 %v1057_v24, %v1057_v24  ;;  %v1060_v28 = vadd.f32 %v1403_v22, %v1059_v41  ;;  %v1375_v29 = vpop.f32.mrb[23].mxu0 }
 0x625   :  { %1499 = vtanh.f32 %v1008_v4  ;;  %v1009_v30 = vmul.f32 0.7978846, %v1007_v26  ;;  %v1065_v31 = vmul.f32 %v1063_v27, %v1057_v24  ;;  %v1064_v32 = vmul.f32 %v1060_v28, %v1060_v28 }
 0x627   :  { %1501 = vtanh.f32 %v1009_v30  ;;  %v1067_v45 = vmul.f32 0.044715, %v1065_v31  ;;  %v1066_v34 = vmul.f32 %v1064_v32, %v1060_v28 }
 0x629   :  { %v1069_v35 = vadd.f32 %v1067_v45, %v1057_v24  ;;  %v1068_v39 = vmul.f32 0.044715, %v1066_v34 }
 0x62b   :  { %v1071_v49 = vmul.f32 0.7978846, %v1069_v35  ;;  %v1070_v40 = vadd.f32 %v1068_v39, %v1060_v28 }
 0x62d   :  { %1503 = vtanh.f32 %v1071_v49  ;;  %v1072_v42 = vmul.f32 0.7978846, %v1070_v40 }
 0x62f   :  { %v1500_v43 = vpop.eup %1499  ;;  %1505 = vtanh.f32 %v1072_v42 }
 0x630   :  { %v1012_v44 = vadd.f32 1.0, %v1500_v43 }
 0x631   :  { %v1502_v46 = vpop.eup %1501 }
 0x632   :  { %v1013_v47 = vadd.f32 1.0, %v1502_v46  ;;  %v1014_v48 = vmul.f32 0.5, %v1012_v44 }
 0x634   :  { %v1015_v50 = vmul.f32 0.5, %v1013_v47  ;;  %v1016_v55 = vmul.f32 %v1014_v48, %v994_v10 }
 0x636   :  { %v1017_v56 = vmul.f32 %v1015_v50, %v997_v14  ;;  %v1414_v14 = vadd.f32 %v1413_v3, %v1262_v5 }
 0x637   :  { %v1504_v57 = vpop.eup %1503 }
 0x638   :  { %v1075_v58 = vadd.f32 1.0, %v1504_v57  ;;  %v1081_v59 = vpack.c.bf16 %v1017_v56, %v1016_v55 }
 0x639   :  { %v1506_v60 = vpop.eup %1505 }
 0x63a   :  { %v1077_v36 = vmul.f32 0.5, %v1075_v58  ;;  %v1076_v38 = vadd.f32 1.0, %v1506_v60  ;;  %1392 = vmatprep.mubr.bf16.mxu1 %v1081_v59 }
 0x63c   :  { %v1078_v61 = vmul.f32 0.5, %v1076_v38  ;;  %v1079_v62 = vmul.f32 %v1077_v36, %v1057_v24 }
 0x63e   :  { %v1080_v63 = vmul.f32 %v1078_v61, %v1060_v28 }
 0x640   :  { %v1082_v0 = vpack.c.bf16 %v1080_v63, %v1079_v62 }
 0x642   :  { %1393 = vmatmul.mubr.bf16.vlgmr.msra.gmra.mrb[20].mxu1 %v1082_v0 }
 0x715   :  { %v1394_v8 = vpop.f32.mrb[20].mxu1 }
 0x716   :  { %v1405_v9 = vadd.f32 %v1404_v6, %v1394_v8  ;;  %v1188_v10 = vpop.f32.mrb[21].mxu1 }
 0x717   :  { %v1408_v12 = vadd.f32 %v1407_v7, %v1188_v10  ;;  %v1395_v13 = vpop.f32.mrb[22].mxu1 }
 0x718   :  { %v1406_v15 = vadd.f32 %v1405_v9, %v1262_v5  ;;  %v1412_v16 = vadd.f32 %v1411_v11, %v1395_v13  ;;  %v1191_v17 = vpop.f32.mrb[23].mxu1 }
 0x719   :  { %v1409_v18 = vadd.f32 %v1408_v12, %v1262_v5  ;;  %v1415_v19 = vadd.f32 %v1414_v14, %v1191_v17 }
 0x71a   :  { %1209 = vst [vmem:[%s2087_s13 + $0x10] sm:$0xff] %v1406_v15  ;;  %1210 = vst [vmem:[%s2087_s13 + $0x18] sm:$0xff] %v1412_v16 }
 0x71b   :  { %1207 = vst [vmem:[%s2087_s13] sm:$0xff] %v1409_v18  ;;  %1208 = vst [vmem:[%s2087_s13 + $0x8] sm:$0xff] %v1415_v19 }
 0x71c   :  { %1215 = vsyncpa [#allocation3], 1 }
 0x71d   :  { %1216 = vsyncpa [#allocation5], 1 }
 0x71e   :  { %1217 = vsyncpa [#allocation8], 1 }
 0x71f   :  { %1218 = vsyncpa [#allocation11], 1 }
 0x720   :  { %1219 = vsyncpa [#allocation14], 1 }

</bundles_post_ra>
